<compile_context>
chip_gen: v7x
topology: tpu7x:2x2x1
jax: 0.10.0
libtpu: 0.0.40
codegen_flags: <defaults>
</compile_context>

<pallas_src>
import functools

import jax
import jax.numpy as jnp
from jax.experimental import pallas as pl
from jax.experimental.pallas import tpu as pltpu


def _round_up(x, m):
    return ((x + m - 1) // m) * m


def _multiwindow_kernel(nw, batch, d_in, hidden, x_ref, w1b1_ref, w2b2_ref, out_ref):
    """Single-invocation kernel: fused window matmul + window-sum + final linear + softmax."""
    # Inner model for ALL windows at once:  tanh(X @ W1 + b1),  X is (NW*B, D_IN).
    # W1 and b1 live in one packed slab (rows [0:d_in] = W1, row d_in = b1); slices are
    # sublane-tile aligned because d_in is a multiple of 8.
    w1 = w1b1_ref[0:d_in, :]
    b1 = w1b1_ref[d_in:d_in + 1, :]
    h = jnp.tanh(
        jnp.dot(x_ref[...], w1, preferred_element_type=jnp.float32) + b1
    )

    # res = sum_w model(x_w): reduce over the window axis with NW-1 static (B, H) vreg adds
    # (slices land on 8-sublane tile boundaries since batch is a multiple of 8).
    acc = h[0:batch, :]
    for i in range(1, nw):
        acc = acc + h[i * batch:(i + 1) * batch, :]

    # res = final(res / counter): the 1/NW mean is already folded into W2 at weight-prep time,
    # so logits = acc @ (W2/NW) + b2.  W2 and b2 live in one packed slab.
    w2 = w2b2_ref[0:hidden, :]
    b2 = w2b2_ref[hidden:hidden + 1, :]
    logits = jnp.dot(acc, w2, preferred_element_type=jnp.float32) + b2

    # res = final_act(res)  (variant > 1 -> Softmax(dim=-1)) over the real class lanes.
    m = logits.max(axis=-1, keepdims=True)
    e = jnp.exp(logits - m)
    out_ref[...] = (e / e.sum(axis=-1, keepdims=True)).astype(out_ref.dtype)


def prepare_weights(w1, b1, w2, b2, num_windows):
    """One-time weight preparation (do NOT run per forward call).

    Packs W1|b1 and (W2 / num_windows)|b2 into two sublane-aligned VMEM slabs and folds the
    1/NW window-mean into W2.
    """
    d_in, hidden = w1.shape
    c = w2.shape[1]

    rows1 = _round_up(d_in + 1, 8)
    w1b1 = (
        jnp.zeros((rows1, hidden), jnp.float32)
        .at[:d_in, :].set(w1.astype(jnp.float32))
        .at[d_in, :].set(b1.reshape(-1).astype(jnp.float32))
    )

    rows2 = _round_up(hidden + 1, 8)
    w2b2 = (
        jnp.zeros((rows2, c), jnp.float32)
        .at[:hidden, :].set(w2.astype(jnp.float32) / jnp.float32(num_windows))
        .at[hidden, :].set(b2.reshape(-1).astype(jnp.float32))
    )
    return w1b1, w2b2


@functools.partial(jax.jit, static_argnames=("d_in", "hidden"))
def multiwindow_forward(windows, w1b1, w2b2, *, d_in, hidden):
    """windows: (NW, B, D_in) f32; w1b1: packed (>=D_in+1, H); w2b2: packed (>=H+1, C)."""
    nw, batch, d = windows.shape
    assert d == d_in
    assert batch % 8 == 0, "batch must be a multiple of 8 for aligned window-reduction slices"
    c = w2b2.shape[1]

    # Fuse the window axis into the matmul M dimension.
    x_flat = windows.reshape(nw * batch, d_in)

    # Advisory cost hint so XLA can overlap the custom call with surrounding ops.
    m_rows = nw * batch
    cost = pl.CostEstimate(
        flops=2 * m_rows * d_in * hidden + 2 * batch * hidden * c
        + m_rows * hidden + batch * c,                        # matmuls + bias adds
        transcendentals=m_rows * hidden + batch * c,          # tanh + exp
        bytes_accessed=4 * (x_flat.size + w1b1.size + w2b2.size + batch * c),
    )

    return pl.pallas_call(
        functools.partial(_multiwindow_kernel, nw, batch, d_in, hidden),
        out_shape=jax.ShapeDtypeStruct((batch, c), jnp.float32),
        in_specs=[pl.BlockSpec(memory_space=pltpu.MemorySpace.VMEM)] * 3,
        out_specs=pl.BlockSpec(memory_space=pltpu.MemorySpace.VMEM),
        cost_estimate=cost,
    )(x_flat, w1b1, w2b2)


def reference_forward(windows, w1, b1, w2, b2):
    """Pure-JAX reference mirroring the PyTorch variant==1.2 path (pinned to highest precision)."""
    with jax.default_matmul_precision("highest"):
        hidden = jnp.tanh(jnp.einsum("wbd,dh->wbh", windows, w1) + b1)   # model(x) per window
        res = hidden.sum(axis=0) / windows.shape[0]                      # sum / counter
        logits = res @ w2 + b2                                           # final(res)
        return jax.nn.softmax(logits, axis=-1)                           # final_act(res)


if __name__ == "__main__":
    key = jax.random.PRNGKey(0)
    k_x, k_w1, k_b1, k_w2, k_b2 = jax.random.split(key, 5)

    # Small shapes consistent with a batched time-series window generator.
    NUM_WINDOWS = 5      # min_size of the GeneralTSModel
    BATCH = 8
    D_IN = 128           # flattened window features (channels * window_len)
    HIDDEN = 128
    CLASSES = 20         # output_classes default

    windows = jax.random.normal(k_x, (NUM_WINDOWS, BATCH, D_IN), dtype=jnp.float32)
    w1 = jax.random.normal(k_w1, (D_IN, HIDDEN), dtype=jnp.float32) * 0.05
    b1 = jax.random.normal(k_b1, (1, HIDDEN), dtype=jnp.float32) * 0.05
    w2 = jax.random.normal(k_w2, (HIDDEN, CLASSES), dtype=jnp.float32) * 0.05
    b2 = jax.random.normal(k_b2, (1, CLASSES), dtype=jnp.float32) * 0.05

    # One-time weight preparation (outside the per-call path).
    w1b1, w2b2 = prepare_weights(w1, b1, w2, b2, NUM_WINDOWS)
    w1b1, w2b2 = jax.block_until_ready((w1b1, w2b2))

    out = multiwindow_forward(windows, w1b1, w2b2, d_in=D_IN, hidden=HIDDEN)
    out = jax.block_until_ready(out)

    ref = reference_forward(windows, w1, b1, w2, b2)
    assert out.shape == (BATCH, CLASSES)
    assert jnp.allclose(out, ref, atol=1e-5, rtol=1e-5), "mismatch vs reference"

    print("KERNEL_OK")
</pallas_src>

<mosaic_0001>
module attributes {stable_mosaic.version = 11 : i64} {
  func.func @_multiwindow_kernel(%arg0: memref<40x128xf32, #tpu.memory_space<vmem>>, %arg1: memref<136x128xf32, #tpu.memory_space<vmem>>, %arg2: memref<136x20xf32, #tpu.memory_space<vmem>>, %arg3: memref<8x20xf32, #tpu.memory_space<vmem>>) attributes {dimension_semantics = [], scalar_prefetch = 0 : i64, scratch_operands = 0 : i64, tpu.core_type = #tpu.core_type<tc>} {
    %c0 = arith.constant 0 : index
    %c0_0 = arith.constant 0 : index
    %0 = vector.load %arg1[%c0, %c0_0] : memref<136x128xf32, #tpu.memory_space<vmem>>, vector<128x128xf32>
    %c128 = arith.constant 128 : index
    %c0_1 = arith.constant 0 : index
    %1 = vector.load %arg1[%c128, %c0_1] : memref<136x128xf32, #tpu.memory_space<vmem>>, vector<1x128xf32>
    %c0_2 = arith.constant 0 : index
    %c0_3 = arith.constant 0 : index
    %2 = vector.load %arg0[%c0_2, %c0_3] : memref<40x128xf32, #tpu.memory_space<vmem>>, vector<40x128xf32>
    %cst = arith.constant dense<0.000000e+00> : vector<40x128xf32>
    %3 = tpu.matmul %2, %0, %cst {dimension_numbers = #tpu.dot_dimension_numbers<[1], [0], [0], [1], [0, 0, 1, 1], [], []>} : vector<40x128xf32>, vector<128x128xf32>, vector<40x128xf32> -> vector<40x128xf32>
    %4 = vector.broadcast %1 : vector<1x128xf32> to vector<40x128xf32>
    %5 = arith.addf %3, %4 : vector<40x128xf32>
    %6 = math.tanh %5 : vector<40x128xf32>
    %7 = vector.extract_strided_slice %6 {offsets = [0, 0], sizes = [8, 128], strides = [1, 1]} : vector<40x128xf32> to vector<8x128xf32>
    %8 = vector.extract_strided_slice %6 {offsets = [8, 0], sizes = [8, 128], strides = [1, 1]} : vector<40x128xf32> to vector<8x128xf32>
    %9 = arith.addf %7, %8 : vector<8x128xf32>
    %10 = vector.extract_strided_slice %6 {offsets = [16, 0], sizes = [8, 128], strides = [1, 1]} : vector<40x128xf32> to vector<8x128xf32>
    %11 = arith.addf %9, %10 : vector<8x128xf32>
    %12 = vector.extract_strided_slice %6 {offsets = [24, 0], sizes = [8, 128], strides = [1, 1]} : vector<40x128xf32> to vector<8x128xf32>
    %13 = arith.addf %11, %12 : vector<8x128xf32>
    %14 = vector.extract_strided_slice %6 {offsets = [32, 0], sizes = [8, 128], strides = [1, 1]} : vector<40x128xf32> to vector<8x128xf32>
    %15 = arith.addf %13, %14 : vector<8x128xf32>
    %c0_4 = arith.constant 0 : index
    %c0_5 = arith.constant 0 : index
    %16 = vector.load %arg2[%c0_4, %c0_5] : memref<136x20xf32, #tpu.memory_space<vmem>>, vector<128x20xf32>
    %c128_6 = arith.constant 128 : index
    %c0_7 = arith.constant 0 : index
    %17 = vector.load %arg2[%c128_6, %c0_7] : memref<136x20xf32, #tpu.memory_space<vmem>>, vector<1x20xf32>
    %cst_8 = arith.constant dense<0.000000e+00> : vector<8x20xf32>
    %18 = tpu.matmul %15, %16, %cst_8 {dimension_numbers = #tpu.dot_dimension_numbers<[1], [0], [0], [1], [0, 0, 1, 1], [], []>} : vector<8x128xf32>, vector<128x20xf32>, vector<8x20xf32> -> vector<8x20xf32>
    %19 = vector.broadcast %17 : vector<1x20xf32> to vector<8x20xf32>
    %20 = arith.addf %18, %19 : vector<8x20xf32>
    %cst_9 = arith.constant dense<0xFF800000> : vector<8xf32>
    %21 = vector.multi_reduction <maximumf>, %20, %cst_9 [1] : vector<8x20xf32> to vector<8xf32>
    %22 = vector.shape_cast %21 : vector<8xf32> to vector<8x1xf32>
    %23 = vector.broadcast %22 : vector<8x1xf32> to vector<8x20xf32>
    %24 = arith.subf %20, %23 : vector<8x20xf32>
    %25 = math.exp %24 : vector<8x20xf32>
    %cst_10 = arith.constant dense<0.000000e+00> : vector<8xf32>
    %26 = vector.multi_reduction <add>, %25, %cst_10 [1] : vector<8x20xf32> to vector<8xf32>
    %27 = vector.shape_cast %26 : vector<8xf32> to vector<8x1xf32>
    %28 = vector.broadcast %27 : vector<8x1xf32> to vector<8x20xf32>
    %29 = arith.divf %25, %28 : vector<8x20xf32>
    %c0_11 = arith.constant 0 : index
    %c0_12 = arith.constant 0 : index
    %30 = vector.load %arg3[%c0_11, %c0_12] : memref<8x20xf32, #tpu.memory_space<vmem>>, vector<8x20xf32>
    tpu.vector_store %arg3[%c0_11, %c0_12], %29 {strides = array<i32>} : memref<8x20xf32, #tpu.memory_space<vmem>>, vector<8x20xf32>,
    return
  }
}

</mosaic_0001>

<bundles_post_ra>
// kernel: multiwindow_forward.1
= control target key start
LH: loop header
LB: loop body
LE: loop exit
PB: predicated region body
PF: predicated region fallthrough
CT: control target
= control target key end

     0   :  { %v470_v3 = vmov 0.0|0.0   ;;  %vm471_vm0 = vmmov 0   ;;  %v472_v6 = vmov 0.0   ;;  %s648_s0 = inlined_call_operand.vmem [shape: f32[40,128], index: 0, kind: input, shape index: {}]   ;;  %s649_s1 = inlined_call_operand.vmem [shape: f32[136,128], index: 1, kind: input, shape index: {}]   ;;  %s650_s2 = inlined_call_operand.vmem [shape: f32[136,20], index: 2, kind: input, shape index: {}]   ;;  %s651_s3 = inlined_call_operand.hbm [shape: f32[8,20], index: 3, kind: output, shape index: {}]  }
   0x1   :  { %v15_v0 = vld [vmem:[%s649_s1] sm:$0xff]  ;;  %v16_v1 = vld [vmem:[%s649_s1 + $0x8] sm:$0xff]  ;;  %v17_v2 = vld [vmem:[%s649_s1 + $0x10] sm:$0xff]  ;;  %380 = vmatprep.subr.bf16.mxu0 %v470_v3  ;;  %330 = vmatprep.mubr.msk.f32.mxu0 %vm471_vm0, %v472_v6 }
   0x2   :  { %v381_v4 = vpack.c.bf16 %v16_v1, %v15_v0  ;;  %v18_v5 = vld [vmem:[%s649_s1 + $0x18] sm:$0xff]  ;;  %404 = vmatprep.subr.bf16.mxu1 %v470_v3  ;;  %377 = vmatprep.mubr.msk.f32.mxu1 %vm471_vm0, %v472_v6  ;;  %v19_v8 = vld [vmem:[%s649_s1 + $0x20] sm:$0xff]  ;;  %v20_v9 = vld [vmem:[%s649_s1 + $0x28] sm:$0xff] }
   0x3   :  { %v384_v7 = vpack.c.bf16 %v18_v5, %v17_v2  ;;  %v387_v10 = vpack.c.bf16 %v20_v9, %v19_v8 }
   0x4   :  { %382 = vmatpush3.bf16.msra.mxu0 %v381_v4 }
   0x5   :  { %383 = vmatprep.subr.bf16.mxu0 %v470_v3 }
   0x8   :  { %385 = vmatpush3.bf16.msra.mxu0 %v384_v7 }
   0x9   :  { %8 = vsyncpa [#allocation3], 0  ;;  %386 = vmatprep.subr.bf16.mxu0 %v470_v3  ;;  %v21_v11 = vld [vmem:[%s649_s1 + $0x30] sm:$0xff]  ;;  %v22_v12 = vld [vmem:[%s649_s1 + $0x38] sm:$0xff]  ;;  %vm231_vm1 = vcmask 162816   ;;  %s473_s7 = smov [#allocation2]  }
   0xa   :  { %v390_v13 = vpack.c.bf16 %v22_v12, %v21_v11  ;;  %v23_v14 = vld [vmem:[%s649_s1 + $0x40] sm:$0xff]  ;;  %v24_v15 = vld [vmem:[%s649_s1 + $0x48] sm:$0xff]  ;;  %v25_v17 = vld [vmem:[%s649_s1 + $0x50] sm:$0xff] }
   0xb   :  { %v393_v16 = vpack.c.bf16 %v24_v15, %v23_v14  ;;  %v26_v18 = vld [vmem:[%s649_s1 + $0x58] sm:$0xff]  ;;  %v27_v20 = vld [vmem:[%s649_s1 + $0x60] sm:$0xff]  ;;  %v28_v21 = vld [vmem:[%s649_s1 + $0x68] sm:$0xff] }
   0xc   :  { %388 = vmatpush3.bf16.msra.mxu0 %v387_v10  ;;  %v396_v19 = vpack.c.bf16 %v26_v18, %v25_v17  ;;  %v399_v22 = vpack.c.bf16 %v28_v21, %v27_v20  ;;  %v29_v23 = vld [vmem:[%s649_s1 + $0x70] sm:$0xff]  ;;  %v30_v24 = vld [vmem:[%s649_s1 + $0x78] sm:$0xff]  ;;  %v32_v26 = vld [vmem:[%s648_s0] sm:$0xff] }
   0xd   :  { %389 = vmatprep.subr.bf16.mxu0 %v470_v3  ;;  %v402_v25 = vpack.c.bf16 %v30_v24, %v29_v23  ;;  %v33_v27 = vld [vmem:[%s648_s0 + $0x8] sm:$0xff]  ;;  %v34_v28 = vld [vmem:[%s648_s0 + $0x10] sm:$0xff]  ;;  %v35_v29 = vld [vmem:[%s648_s0 + $0x18] sm:$0xff] }
   0xe   :  { %v36_v30 = vld [vmem:[%s648_s0 + $0x20] sm:$0xff]  ;;  %v141_v32 = vld [vmem:[%s650_s2 + $0x8] sm:$0xff]  ;;  %v142_v34 = vld [vmem:[%s650_s2 + $0x10] sm:$0xff]  ;;  %s250_s0 = sshll.u32 %s473_s7, 4  ;;  %s251_s0 = int_to_ptr.vmem [resolvable:$true] %s250_s0 }
   0xf   :  { %v140_v31 = vld [vmem:[%s650_s2] sm:$0xff]  ;;  %v143_v35 = vld [vmem:[%s650_s2 + $0x18] sm:$0xff]  ;;  %v145_v38 = vld [vmem:[%s650_s2 + $0x28] sm:$0xff]  ;;  %p451_p1 = scmp.lt.s32.totalorder %s251_s0, %s251_s0 }
  0x10   :  { %391 = vmatpush3.bf16.msra.mxu0 %v390_v13  ;;  %v405_v33 = vpack.c.bf16 %v141_v32, %v140_v31  ;;  %v408_v36 = vpack.c.bf16 %v143_v35, %v142_v34  ;;  %v144_v37 = vld [vmem:[%s650_s2 + $0x20] sm:$0xff]  ;;  %v146_v40 = vld [vmem:[%s650_s2 + $0x30] sm:$0xff]  ;;  %v147_v41 = vld [vmem:[%s650_s2 + $0x38] sm:$0xff] }
  0x11   :  { %392 = vmatprep.subr.bf16.mxu0 %v470_v3  ;;  %v411_v39 = vpack.c.bf16 %v145_v38, %v144_v37  ;;  %v414_v42 = vpack.c.bf16 %v147_v41, %v146_v40  ;;  %v148_v43 = vld [vmem:[%s650_s2 + $0x40] sm:$0xff]  ;;  %v149_v44 = vld [vmem:[%s650_s2 + $0x48] sm:$0xff]  ;;  %v150_v46 = vld [vmem:[%s650_s2 + $0x50] sm:$0xff] }
  0x12   :  { %406 = vmatpush3.bf16.msra.mxu1 %v405_v33  ;;  %v417_v45 = vpack.c.bf16 %v149_v44, %v148_v43  ;;  %v151_v47 = vld [vmem:[%s650_s2 + $0x58] sm:$0xff]  ;;  %v152_v49 = vld [vmem:[%s650_s2 + $0x60] sm:$0xff]  ;;  %v153_v50 = vld [vmem:[%s650_s2 + $0x68] sm:$0xff] }
  0x13   :  { %407 = vmatprep.subr.bf16.mxu1 %v470_v3  ;;  %v420_v48 = vpack.c.bf16 %v151_v47, %v150_v46  ;;  %v423_v51 = vpack.c.bf16 %v153_v50, %v152_v49  ;;  %v154_v52 = vld [vmem:[%s650_s2 + $0x70] sm:$0xff]  ;;  %v155_v53 = vld [vmem:[%s650_s2 + $0x78] sm:$0xff]  ;;  %v258_v55 = vld [vmem:[%s649_s1 + $0x80] ss:$0 sm:$0xff] }
  0x14   :  { %394 = vmatpush3.bf16.msra.mxu0 %v393_v16  ;;  %v426_v54 = vpack.c.bf16 %v155_v53, %v154_v52  ;;  %v259_v16 = vld [vmem:[%s650_s2 + $0x80] ss:$0 sm:$0xff]  ;;  %s446_s2 = scalar_lea.vmem %s251_s0, 128 }
  0x15   :  { %395 = vmatprep.subr.bf16.mxu0 %v470_v3  ;;  %p447_p0 = scmp.ne.s32.totalorder %s251_s0, %s446_s2  ;;  %p452_p2 = scmp.lt.s32.totalorder %s446_s2, %s446_s2 }
  0x16   :  { %409 = vmatpush3.bf16.msra.mxu1 %v408_v36 }
  0x17   :  { %410 = vmatprep.subr.bf16.mxu1 %v470_v3  ;;  %p453_p3 = por %p452_p2, %p451_p1 }
  0x18   :  { %397 = vmatpush3.bf16.msra.mxu0 %v396_v19 }
  0x19   :  { %398 = vmatprep.subr.bf16.mxu0 %v470_v3  ;;  %p454_p4 = pnand %p453_p3, %p447_p0 }
  0x1a   :  { %412 = vmatpush3.bf16.msra.mxu1 %v411_v39 }
  0x1b   :  { %413 = vmatprep.subr.bf16.mxu1 %v470_v3 }
  0x1c   :  { %400 = vmatpush3.bf16.msra.mxu0 %v399_v22 }
  0x1d   :  { %401 = vmatprep.subr.bf16.mxu0 %v470_v3 }
  0x1e   :  { %415 = vmatpush3.bf16.msra.mxu1 %v414_v42 }
  0x1f   :  { %416 = vmatprep.subr.bf16.mxu1 %v470_v3 }
  0x20   :  { %403 = vmatpush3.bf16.msra.mxu0 %v402_v25 }
  0x22   :  { %418 = vmatpush3.bf16.msra.mxu1 %v417_v45 }
  0x23   :  { %331 = vmatmul.mubr.f32.vlgmr.msra.gmra.mrb[0].mxu0 %v32_v26  ;;  %419 = vmatprep.subr.bf16.mxu1 %v470_v3 }
  0x24   :  { %333 = vmatprep.mubr.msk.f32.mxu0 %vm471_vm0, %v472_v6 }
  0x26   :  { %421 = vmatpush3.bf16.msra.mxu1 %v420_v48 }
  0x27   :  { %334 = vmatmul.mubr.f32.gmra.mrb[2].mxu0 %v33_v27  ;;  %422 = vmatprep.subr.bf16.mxu1 %v470_v3 }
  0x28   :  { %336 = vmatprep.mubr.msk.f32.mxu0 %vm471_vm0, %v472_v6 }
  0x2a   :  { %424 = vmatpush3.bf16.msra.mxu1 %v423_v51 }
  0x2b   :  { %337 = vmatmul.mubr.f32.gmra.mrb[4].mxu0 %v34_v28  ;;  %425 = vmatprep.subr.bf16.mxu1 %v470_v3 }
  0x2c   :  { %339 = vmatprep.mubr.msk.f32.mxu0 %vm471_vm0, %v472_v6 }
  0x2e   :  { %427 = vmatpush3.bf16.msra.mxu1 %v426_v54 }
  0x2f   :  { %340 = vmatmul.mubr.f32.gmra.mrb[6].mxu0 %v35_v29 }
  0x30   :  { %342 = vmatprep.mubr.msk.f32.mxu0 %vm471_vm0, %v472_v6 }
  0x33   :  { %343 = vmatmul.mubr.f32.gmra.mrb[8].mxu0 %v36_v30 }
  0xf6   :  { %v107_v56 = vpop.f32.mrb[0].mxu0 }
  0xf7   :  { %v332_v57 = vpop.f32.mrb[1].mxu0  ;;  %v108_v58 = vadd.f32 %v258_v55, %v107_v56 }
  0xf9   :  { %432 = vtanh.f32 %v108_v58 }
  0xfa   :  { %v112_v59 = vpop.f32.mrb[2].mxu0 }
  0xfb   :  { %v113_v60 = vadd.f32 %v258_v55, %v112_v59  ;;  %v335_v61 = vpop.f32.mrb[3].mxu0 }
  0xfd   :  { %434 = vtanh.f32 %v113_v60 }
  0xfe   :  { %v117_v62 = vpop.f32.mrb[4].mxu0 }
  0xff   :  { %v118_v63 = vadd.f32 %v258_v55, %v117_v62  ;;  %v338_v0 = vpop.f32.mrb[5].mxu0 }
 0x101   :  { %436 = vtanh.f32 %v118_v63 }
 0x102   :  { %v122_v1 = vpop.f32.mrb[6].mxu0 }
 0x103   :  { %v123_v2 = vadd.f32 %v258_v55, %v122_v1  ;;  %v341_v3 = vpop.f32.mrb[7].mxu0  ;;  %v433_v4 = vpop.eup %432 }
 0x105   :  { %438 = vtanh.f32 %v123_v2 }
 0x106   :  { %v127_v5 = vpop.f32.mrb[8].mxu0 }
 0x107   :  { %v435_v6 = vpop.eup %434  ;;  %v128_v7 = vadd.f32 %v258_v55, %v127_v5  ;;  %v344_v8 = vpop.f32.mrb[9].mxu0 }
 0x108   :  { %v136_v9 = vadd.f32 %v435_v6, %v433_v4 }
 0x109   :  { %440 = vtanh.f32 %v128_v7 }
 0x10b   :  { %v437_v10 = vpop.eup %436 }
 0x10c   :  { %v137_v11 = vadd.f32 %v437_v10, %v136_v9 }
 0x10f   :  { %v439_v12 = vpop.eup %438 }
 0x110   :  { %v138_v13 = vadd.f32 %v439_v12, %v137_v11 }
 0x113   :  { %v441_v14 = vpop.eup %440 }
 0x114   :  { %v139_v15 = vadd.f32 %v441_v14, %v138_v13 }
 0x116   :  { %378 = vmatmul.mubr.f32.vlgmr.msra.gmra.mrb[0].mxu1 %v139_v15 }
 0x1e9   :  { %v227_v17 = vpop.f32.mrb[0].mxu1 }
 0x1ea   :  { %v228_v18 = vadd.f32 %v259_v16, %v227_v17  ;;  %v379_v19 = vpop.f32.mrb[1].mxu1 }
 0x1ec   :  { %v232_v20 = vsel %vm231_vm1, %v228_v18, -inf }
 0x1ed   :  { %233 = vmax.xlane.f32.xlu0 %v232_v20 }
 0x27a   :  { %v234_v21 = vpop.xlane.xlu0 %233 }
 0x27b   :  { %v235_v22 = vsub.f32 %v228_v18, %v234_v21 }
 0x27d   :  { %v236_v23 = vmul.f32 1.442695, %v235_v22 }
 0x27f   :  { %442 = vpow2.f32 %v236_v23 }
 0x289   :  { %v443_v24 = vpop.eup %442 }
 0x28a   :  { %v238_v25 = vsel %vm231_vm1, %v443_v24, 0.0 }
 0x28b   :  { %239 = vadd.xlane.f32.xlu0 %v238_v25 }
 0x318   :  { %v240_v26 = vpop.xlane.xlu0 %239 }
 0x319   :  { %444 = vrcp.f32 %v240_v26 }
 0x323   :  { %v445_v27 = vpop.eup %444 }
 0x324   :  { %v242_v28 = vmul.f32 %v445_v27, %v443_v24 }
 0x326   :  { %243 = vst.msk [vmem:[#allocation2] sm:$0xff] %vm231_vm1, %v242_v28 }
 0x327   :  { %457 = shalt.err (!%p454_p4)
}
 0x328   :  { %s458_s10 = scalar_lea.hbm %s651_s3, 128 }
 0x329   :  { %p459_p5 = scmp.ne.s32.totalorder %s651_s3, %s458_s10  ;;  %p462_p6 = scmp.lt.u32.totalorder %s458_s10, %s651_s3 }
 0x32b   :  { %p464_p7 = pnand %p462_p6, %p459_p5 }
 0x32d   :  { %467 = shalt.err (!%p464_p7)
}
 0x32e   :  { %253 = dma.vmem_to_hbm [thread:$0]  %s251_s0, 128, %s651_s3, [#allocation3]  }
 0x32f   :  { %468 = dma.done.wait [#allocation3], 128  }
 0x330   :  { %469 = vsyncadd [#allocation3], 4294967168 }
 0x331   :  { %257 = vsyncpa [#allocation3], 1 }

</bundles_post_ra>
